<compile_context>
chip_gen: v6e
topology: v6e:2x2x1
jax: 0.10.0
libtpu: 0.0.40
codegen_flags: <defaults>
</compile_context>

<pallas_src>
import jax
import jax.numpy as jnp
from jax.experimental import pallas as pl
from jax.experimental.pallas import tpu as pltpu  # noqa: F401  (TPU backend assumed)


def _arg_net_kernel(x_ref, w_ref, b_ref, o_ref):
    # x_ref: (B, D)   VMEM
    # w_ref: (D, W)   VMEM  — packed [w0.T | w1.T | pad], W a multiple of 128
    # b_ref: (1, W)   VMEM  — packed [b0 | b1 | pad]
    # o_ref: (B, W)   VMEM  — lane-dense output (unmasked vst)
    y = jnp.dot(x_ref[...], w_ref[...], preferred_element_type=jnp.float32)
    y = y + b_ref[...]
    o_ref[...] = jnp.maximum(y, 0.0).astype(o_ref.dtype)


def pack_arg_net_params(w0, b0, w1, b1):
    """Pack both Linear heads into one lane-dense weight slab.  Call ONCE at init.

    w0, w1: (A, D) torch-layout Linear weights; b0, b1: (A,) biases.
    Returns (w_packed (D, W), b_packed (1, W)) with W = 128-rounded 2*A.
    """
    A, D = w0.shape
    W = ((2 * A + 127) // 128) * 128  # lane-dense: multiple of 128
    w_packed = jnp.zeros((D, W), dtype=w0.dtype)
    w_packed = w_packed.at[:, :A].set(w0.T)
    w_packed = w_packed.at[:, A:2 * A].set(w1.T)
    b_packed = jnp.zeros((1, W), dtype=b0.dtype)
    b_packed = b_packed.at[0, :A].set(b0)
    b_packed = b_packed.at[0, A:2 * A].set(b1)
    return w_packed, b_packed


def arg_net_forward(hidden, w_packed, b_packed, arg_dim):
    """hidden: (B, D) f32; packed params from pack_arg_net_params.

    Returns (arg0, arg1), each (B, arg_dim) — same semantics as the torch module:
    relu(hidden @ w0.T + b0), relu(hidden @ w1.T + b1).
    """
    B, D = hidden.shape
    W = w_packed.shape[1]

    full = lambda shape: pl.BlockSpec(shape, lambda: (0,) * len(shape))

    cost = pl.CostEstimate(
        flops=2 * B * D * W,
        transcendentals=0,
        bytes_accessed=(B * D + D * W + W + B * W) * 4,
    )

    out = pl.pallas_call(
        _arg_net_kernel,
        out_shape=jax.ShapeDtypeStruct((B, W), hidden.dtype),
        grid=(),  # tiny problem: single invocation, full-array blocks in VMEM
        in_specs=[full((B, D)), full((D, W)), full((1, W))],
        out_specs=full((B, W)),
        cost_estimate=cost,
    )(hidden, w_packed, b_packed)

    arg0 = out[:, :arg_dim]
    arg1 = out[:, arg_dim:2 * arg_dim]
    return arg0, arg1


def _init_params(key, npi_core_dim=256, arg_dim=15):
    # Deterministic init mimicking torch.nn.Linear default: U(-1/sqrt(in), 1/sqrt(in))
    bound = 1.0 / jnp.sqrt(jnp.float32(npi_core_dim))
    k0w, k0b, k1w, k1b = jax.random.split(key, 4)
    w0 = jax.random.uniform(k0w, (arg_dim, npi_core_dim), jnp.float32, -bound, bound)
    b0 = jax.random.uniform(k0b, (arg_dim,), jnp.float32, -bound, bound)
    w1 = jax.random.uniform(k1w, (arg_dim, npi_core_dim), jnp.float32, -bound, bound)
    b1 = jax.random.uniform(k1b, (arg_dim,), jnp.float32, -bound, bound)
    return w0, b0, w1, b1


if __name__ == "__main__":
    key = jax.random.PRNGKey(0)
    k_in, k_par = jax.random.split(key)

    B, D, A = 2, 256, 15
    hidden = jax.random.normal(k_in, (B, D), jnp.float32)
    w0, b0, w1, b1 = _init_params(k_par, npi_core_dim=D, arg_dim=A)

    # One-time packing (init-time, not per-call).
    w_packed, b_packed = pack_arg_net_params(w0, b0, w1, b1)

    arg0, arg1 = arg_net_forward(hidden, w_packed, b_packed, arg_dim=A)
    jax.block_until_ready((arg0, arg1))

    # Reference check in plain JAX (same semantics as torch: relu(x @ W.T + b))
    ref0 = jnp.maximum(hidden @ w0.T + b0, 0.0)
    ref1 = jnp.maximum(hidden @ w1.T + b1, 0.0)
    assert arg0.shape == (B, A) and arg1.shape == (B, A)
    assert jnp.allclose(arg0, ref0, atol=1e-5), "arg0 mismatch"
    assert jnp.allclose(arg1, ref1, atol=1e-5), "arg1 mismatch"

    print("KERNEL_OK")
</pallas_src>

<mosaic_0001>
module attributes {stable_mosaic.version = 11 : i64} {
  func.func @_arg_net_kernel(%arg0: memref<2x256xf32, #tpu.memory_space<vmem>>, %arg1: memref<256x128xf32, #tpu.memory_space<vmem>>, %arg2: memref<1x128xf32, #tpu.memory_space<vmem>>, %arg3: memref<2x128xf32, #tpu.memory_space<vmem>>) attributes {dimension_semantics = [], scalar_prefetch = 0 : i64, scratch_operands = 0 : i64, tpu.core_type = #tpu.core_type<tc>} {
    %c0 = arith.constant 0 : index
    %c0_0 = arith.constant 0 : index
    %0 = vector.load %arg0[%c0, %c0_0] : memref<2x256xf32, #tpu.memory_space<vmem>>, vector<2x256xf32>
    %c0_1 = arith.constant 0 : index
    %c0_2 = arith.constant 0 : index
    %1 = vector.load %arg1[%c0_1, %c0_2] : memref<256x128xf32, #tpu.memory_space<vmem>>, vector<256x128xf32>
    %cst = arith.constant dense<0.000000e+00> : vector<2x128xf32>
    %2 = tpu.matmul %0, %1, %cst {dimension_numbers = #tpu.dot_dimension_numbers<[1], [0], [0], [1], [0, 0, 1, 1], [], []>} : vector<2x256xf32>, vector<256x128xf32>, vector<2x128xf32> -> vector<2x128xf32>
    %c0_3 = arith.constant 0 : index
    %c0_4 = arith.constant 0 : index
    %3 = vector.load %arg2[%c0_3, %c0_4] : memref<1x128xf32, #tpu.memory_space<vmem>>, vector<1x128xf32>
    %4 = vector.broadcast %3 : vector<1x128xf32> to vector<2x128xf32>
    %5 = arith.addf %2, %4 : vector<2x128xf32>
    %cst_5 = arith.constant 0.000000e+00 : f32
    %6 = vector.broadcast %cst_5 : f32 to vector<2x128xf32>
    %7 = arith.maximumf %5, %6 : vector<2x128xf32>
    %c0_6 = arith.constant 0 : index
    %c0_7 = arith.constant 0 : index
    %8 = vector.load %arg3[%c0_6, %c0_7] : memref<2x128xf32, #tpu.memory_space<vmem>>, vector<2x128xf32>
    tpu.vector_store %arg3[%c0_6, %c0_7], %7 {strides = array<i32>} : memref<2x128xf32, #tpu.memory_space<vmem>>, vector<2x128xf32>,
    return
  }
}

</mosaic_0001>

<bundles_post_ra>
// kernel: tpu_custom_call.1
= control target key start
LH: loop header
LB: loop body
LE: loop exit
PB: predicated region body
PF: predicated region fallthrough
CT: control target
= control target key end

     0   :  { %8 = vsyncpa [#allocation3], 0  ;;  %s325_s0 = inlined_call_operand.hbm [shape: f32[2,256], index: 0, kind: input, shape index: {}]   ;;  %s326_s1 = inlined_call_operand.hbm [shape: f32[256,128], index: 1, kind: input, shape index: {}]   ;;  %s327_s2 = inlined_call_operand.vmem [shape: f32[1,128], index: 2, kind: input, shape index: {}]   ;;  %s328_s3 = inlined_call_operand.hbm [shape: f32[2,128], index: 3, kind: output, shape index: {}]  }
   0x1   :  { %9 = vsyncpa [#allocation6], 0 }
   0x2   :  { %10 = vsyncpa [#allocation4], 0  ;;  %s288_s12 = smov [#allocation2]   ;;  %s289_s14 = smov [#allocation5]  }
   0x3   :  { %s17_s13 = sshll.u32 %s288_s12, 4  ;;  %s26_s15 = sshll.u32 %s289_s14, 4  ;;  %s18_s13 = int_to_ptr.vmem [resolvable:$true] %s17_s13  ;;  %s27_s15 = int_to_ptr.vmem [resolvable:$true] %s26_s15 }
   0x4   :  { %s230_s16 = scalar_lea.vmem %s18_s13, 64  ;;  %p235_p1 = scmp.lt.s32.totalorder %s18_s13, %s18_s13 }
   0x5   :  { %p231_p0 = scmp.ne.s32.totalorder %s18_s13, %s230_s16  ;;  %p236_p2 = scmp.lt.s32.totalorder %s230_s16, %s230_s16 }
   0x7   :  { %p237_p3 = por %p236_p2, %p235_p1 }
   0x9   :  { %p238_p4 = pnand %p237_p3, %p231_p0 }
   0xb   :  { %241 = shalt.err (!%p238_p4)
}
   0xc   :  { %20 = dma.hbm_to_vmem [thread:$0]  %s325_s0, 64, %s18_s13, [#allocation3]  }
   0xd   :  { %s250_s19 = scalar_lea.vmem %s27_s15, 4096  ;;  %p255_p6 = scmp.lt.s32.totalorder %s27_s15, %s27_s15 }
   0xe   :  { %p251_p5 = scmp.ne.s32.totalorder %s27_s15, %s250_s19  ;;  %p256_p7 = scmp.lt.s32.totalorder %s250_s19, %s250_s19 }
  0x10   :  { %p257_p8 = por %p256_p7, %p255_p6 }
  0x12   :  { %p258_p9 = pnand %p257_p8, %p251_p5 }
  0x14   :  { %261 = shalt.err (!%p258_p9)
}
  0x15   :  { %s290_s20 = smov 128   ;;  %s291_s21 = smov 8  }
  0x16   :  { %32 = dma.hbm_to_vmem [thread:$0]  %s326_s1, 4096, %s27_s15, [#allocation6], %s290_s20, %s290_s20, %s291_s21  }
  0x17   :  { %282 = dma.done.wait [#allocation3], 64  }
  0x18   :  { %283 = vsyncadd [#allocation3], 4294967232 }
  0x19   :  { %284 = dma.done.wait [#allocation6], 4096  }
  0x1a   :  { %285 = vsyncadd [#allocation6], 4294963200  ;;  %v73_v0 = vld [vmem:[#allocation5 + $0xf8] sm:$0xff]  ;;  %v72_v2 = vld [vmem:[#allocation5 + $0xf0] sm:$0xff]  ;;  %s292_s24 = smov [#allocation7]  }
  0x1b   :  { %v57_v1 = vld [vmem:[#allocation5 + $0x78] sm:$0xff]  ;;  %182 = vmatprep.subr.mxu0 %v73_v0  ;;  %v56_v3 = vld [vmem:[#allocation5 + $0x70] sm:$0xff]  ;;  %v71_v4 = vld [vmem:[#allocation5 + $0xe8] sm:$0xff]  ;;  %s170_s25 = sshll.u32 %s292_s24, 4  ;;  %s171_s25 = int_to_ptr.vmem [resolvable:$true] %s170_s25 }
  0x1c   :  { %183 = vmatpush3.msra.mxu0 %v57_v1  ;;  %v55_v5 = vld [vmem:[#allocation5 + $0x68] sm:$0xff]  ;;  %v70_v6 = vld [vmem:[#allocation5 + $0xe0] sm:$0xff]  ;;  %v69_v8 = vld [vmem:[#allocation5 + $0xd8] sm:$0xff]  ;;  %s262_s26 = scalar_lea.vmem %s171_s25, 32  ;;  %p267_p11 = scmp.lt.s32.totalorder %s171_s25, %s171_s25 }
  0x1d   :  { %184 = vmatprep.subr.mxu0 %v72_v2  ;;  %v54_v7 = vld [vmem:[#allocation5 + $0x60] sm:$0xff]  ;;  %v53_v9 = vld [vmem:[#allocation5 + $0x58] sm:$0xff]  ;;  %v68_v10 = vld [vmem:[#allocation5 + $0xd0] sm:$0xff]  ;;  %p263_p10 = scmp.ne.s32.totalorder %s171_s25, %s262_s26  ;;  %p268_p12 = scmp.lt.s32.totalorder %s262_s26, %s262_s26 }
  0x1e   :  { %185 = vmatpush3.msra.mxu0 %v56_v3  ;;  %v52_v11 = vld [vmem:[#allocation5 + $0x50] sm:$0xff]  ;;  %v67_v12 = vld [vmem:[#allocation5 + $0xc8] sm:$0xff]  ;;  %v181_v13 = vld.sshfl [vmem:[#allocation2] sm:$0x33 pattern:$0x76325410] }
  0x1f   :  { %186 = vmatprep.subr.mxu0 %v71_v4  ;;  %v51_v14 = vld [vmem:[#allocation5 + $0x48] sm:$0xff]  ;;  %v89_v15 = vcombine.high %v181_v13, %v181_v13  ;;  %v66_v16 = vld [vmem:[#allocation5 + $0xc0] sm:$0xff]  ;;  %v65_v18 = vld [vmem:[#allocation5 + $0xb8] sm:$0xff]  ;;  %p269_p13 = por %p268_p12, %p267_p11 }
  0x20   :  { %187 = vmatpush3.msra.mxu0 %v55_v5  ;;  %v50_v17 = vld [vmem:[#allocation5 + $0x40] sm:$0xff]  ;;  %v49_v19 = vld [vmem:[#allocation5 + $0x38] sm:$0xff]  ;;  %v64_v20 = vld [vmem:[#allocation5 + $0xb0] sm:$0xff] }
  0x21   :  { %188 = vmatprep.subr.mxu0 %v70_v6  ;;  %156 = vmatprep.mubr.f32.mxu0 %v89_v15  ;;  %v48_v21 = vld [vmem:[#allocation5 + $0x30] sm:$0xff]  ;;  %v63_v22 = vld [vmem:[#allocation5 + $0xa8] sm:$0xff]  ;;  %v62_v24 = vld [vmem:[#allocation5 + $0xa0] sm:$0xff]  ;;  %p270_p0 = pnand %p269_p13, %p263_p10 }
  0x22   :  { %189 = vmatpush3.msra.mxu0 %v54_v7  ;;  %v47_v23 = vld [vmem:[#allocation5 + $0x28] sm:$0xff]  ;;  %v46_v25 = vld [vmem:[#allocation5 + $0x20] sm:$0xff]  ;;  %v61_v26 = vld [vmem:[#allocation5 + $0x98] sm:$0xff] }
  0x23   :  { %190 = vmatprep.subr.mxu0 %v69_v8  ;;  %v45_v27 = vld [vmem:[#allocation5 + $0x18] sm:$0xff]  ;;  %v60_v28 = vld [vmem:[#allocation5 + $0x90] sm:$0xff]  ;;  %v59_v30 = vld [vmem:[#allocation5 + $0x88] sm:$0xff] }
  0x24   :  { %191 = vmatpush3.msra.mxu0 %v53_v9  ;;  %v44_v29 = vld [vmem:[#allocation5 + $0x10] sm:$0xff]  ;;  %v43_v31 = vld [vmem:[#allocation5 + $0x8] sm:$0xff]  ;;  %v58_v32 = vld [vmem:[#allocation5 + $0x80] sm:$0xff] }
  0x25   :  { %192 = vmatprep.subr.mxu0 %v68_v10  ;;  %v42_v33 = vld [vmem:[#allocation5] sm:$0xff]  ;;  %v180_v35 = vld [vmem:[%s327_s2] ss:$0 sm:$0xff] }
  0x26   :  { %193 = vmatpush3.msra.mxu0 %v52_v11 }
  0x27   :  { %194 = vmatprep.subr.mxu0 %v67_v12 }
  0x28   :  { %195 = vmatpush3.msra.mxu0 %v51_v14 }
  0x29   :  { %196 = vmatprep.subr.mxu0 %v66_v16 }
  0x2a   :  { %197 = vmatpush3.msra.mxu0 %v50_v17 }
  0x2b   :  { %198 = vmatprep.subr.mxu0 %v65_v18 }
  0x2c   :  { %199 = vmatpush3.msra.mxu0 %v49_v19 }
  0x2d   :  { %200 = vmatprep.subr.mxu0 %v64_v20 }
  0x2e   :  { %201 = vmatpush3.msra.mxu0 %v48_v21 }
  0x2f   :  { %202 = vmatprep.subr.mxu0 %v63_v22 }
  0x30   :  { %203 = vmatpush3.msra.mxu0 %v47_v23 }
  0x31   :  { %204 = vmatprep.subr.mxu0 %v62_v24 }
  0x32   :  { %205 = vmatpush3.msra.mxu0 %v46_v25 }
  0x33   :  { %206 = vmatprep.subr.mxu0 %v61_v26 }
  0x34   :  { %207 = vmatpush3.msra.mxu0 %v45_v27 }
  0x35   :  { %208 = vmatprep.subr.mxu0 %v60_v28 }
  0x36   :  { %209 = vmatpush3.msra.mxu0 %v44_v29 }
  0x37   :  { %210 = vmatprep.subr.mxu0 %v59_v30 }
  0x38   :  { %211 = vmatpush3.msra.mxu0 %v43_v31 }
  0x39   :  { %212 = vmatprep.subr.mxu0 %v58_v32 }
  0x3a   :  { %213 = vmatpush3.msra.mxu0 %v42_v33 }
  0x3b   :  { %157 = vmatmul.mubr.f32.vlgmr.msra.gmra.mxu0 %v181_v13 }
  0xfb   :  { %v214_v34 = vpop.f32.mrf.mxu0 }
  0xfd   :  { %v215_v36 = vpop.f32.mrf.mxu0 }
  0xfe   :  { %v216_v37 = vadd.f32 %v215_v36, %v214_v34 }
 0x100   :  { %v159_v38 = vadd.f32 %v216_v37, %v180_v35 }
 0x102   :  { %v162_v39 = vmax.f32 %v159_v38, 0.0 }
 0x104   :  { %163 = vst [vmem:[#allocation7] sm:$0x3] %v162_v39 }
 0x105   :  { %273 = shalt.err (!%p270_p0)
}
 0x106   :  { %173 = dma.vmem_to_hbm [thread:$0]  %s171_s25, 32, %s328_s3, [#allocation4]  }
 0x107   :  { %286 = dma.done.wait [#allocation4], 32  }
 0x108   :  { %287 = vsyncadd [#allocation4], 4294967264 }
 0x109   :  { %177 = vsyncpa [#allocation3], 1 }
 0x10a   :  { %178 = vsyncpa [#allocation6], 1 }
 0x10b   :  { %179 = vsyncpa [#allocation4], 1 }

</bundles_post_ra>
